<compile_context>
chip_gen: v6e
topology: v6e:2x2x1
jax: 0.10.0
libtpu: 0.0.40
codegen_flags: <defaults>
</compile_context>

<pallas_src>
import functools

import jax
import jax.numpy as jnp
from jax.experimental import pallas as pl
from jax.experimental.pallas import tpu as pltpu

GAMMA = 1.5
ALPHA = 0.25
LANE = 128            # lane width (last dim of the streaming slab)
TM_MAX = 8192         # rows per grid block -> 4 MiB f32 per input stream
CHUNK_ROWS = 512      # rows per in-kernel chunk -> 256 KiB f32 per temporary
PAD_LOGIT = -1.0e4    # sentinel logit: exp(-|x|)=0 -> bce=0, p=0, (1-p_t)=0


def _row_align(dtype):
    """Sublane tile for the dtype: (8,128) f32, (16,128) bf16/f16, (32,128) int8/bool."""
    itemsize = jnp.dtype(dtype).itemsize
    return {1: 32, 2: 16}.get(itemsize, 8)


def _vmem_limit_bytes():
    # Generation-aware scoped-VMEM request: ~3/4 of physical, capped at 64 MiB
    # (v5e/v6e have 128 MiB physical -> 64 MiB; v7x has 64 MiB -> 48 MiB).
    # Actual usage: 2 streams x 2 buffers x <=4 MiB plus a few MiB of chunked
    # scratch, so every generation has ample headroom.
    try:
        phys = int(pltpu.get_tpu_info().vmem_capacity_bytes)
    except Exception:
        phys = 64 * 1024 * 1024
    return max(32 * 1024 * 1024, min(64 * 1024 * 1024, (phys * 3) // 4))


def _focal_loss_kernel(pred_ref, true_ref, part_ref, *, tm, gamma, alpha):
    """One grid step: focal loss of a (tm, 128) block reduced to an (8, 128)
    f32 partial sum.  Processed in CHUNK_ROWS-row chunks so live temporaries
    stay in a few hundred KiB of VMEM even for multi-MiB blocks."""
    a_bias = jnp.float32(1.0 - alpha)           # alpha_factor = a_bias + y*a_slope
    a_slope = jnp.float32(2.0 * alpha - 1.0)

    def chunk_sum(row0, nrows):
        x = pred_ref[pl.ds(row0, nrows), :].astype(jnp.float32)
        y = true_ref[pl.ds(row0, nrows), :].astype(jnp.float32)
        # Shared transcendental: e = exp(-|x|) feeds both the stable BCE and
        # sigmoid; (1 + e) is shared by log and reciprocal.
        e = jnp.exp(-jnp.abs(x))
        denom = 1.0 + e
        # Numerically stable BCE-with-logits: max(x,0) - x*y + log(1 + exp(-|x|)).
        bce = jnp.maximum(x, 0.0) - x * y + jnp.log(denom)
        inv = pl.reciprocal(denom, approx=True)            # EUP slot has slack
        p = jnp.where(x >= 0.0, inv, e * inv)              # sigmoid(x)
        # 1 - p_t == p + y*(1 - 2p).  The clamp guards the sqrt against fp
        # rounding; the PyTorch reference leaves it unclamped (would NaN).
        one_m_pt = jnp.maximum(p + y * (1.0 - 2.0 * p), 0.0)
        alpha_factor = a_bias + y * a_slope
        if gamma == 1.5:                                    # static specialization
            mod = one_m_pt * jnp.sqrt(one_m_pt)
        elif gamma == 2.0:
            mod = one_m_pt * one_m_pt
        elif gamma == 1.0:
            mod = one_m_pt
        else:
            mod = one_m_pt ** gamma
        loss = bce * (alpha_factor * mod)
        # VPU-only partial reduction: (nrows,128) -> (nrows//8,8,128) -> sum axis 0.
        return jnp.sum(loss.reshape(nrows // 8, 8, LANE), axis=0)

    n_full = tm // CHUNK_ROWS
    rem = tm % CHUNK_ROWS
    acc = jnp.zeros((8, LANE), jnp.float32)
    if n_full > 0:
        def body(c, a):
            row0 = pl.multiple_of(c * CHUNK_ROWS, CHUNK_ROWS)
            return a + chunk_sum(row0, CHUNK_ROWS)
        acc = jax.lax.fori_loop(0, n_full, body, acc)
    if rem > 0:
        acc = acc + chunk_sum(n_full * CHUNK_ROWS, rem)
    part_ref[...] = acc


def _focal_elementwise_sum(pred, true, gamma, alpha):
    """Plain-JAX focal-loss sum for the (< one block) tail of aligned inputs."""
    x = pred.astype(jnp.float32)
    y = true.astype(jnp.float32)
    bce = jnp.maximum(x, 0.0) - x * y + jnp.log1p(jnp.exp(-jnp.abs(x)))
    p = jax.nn.sigmoid(x)
    one_m_pt = p + y * (1.0 - 2.0 * p)
    af = (1.0 - alpha) + y * (2.0 * alpha - 1.0)
    return jnp.sum(bce * af * (one_m_pt ** gamma))


def focal_loss(pred, true, gamma=GAMMA, alpha=ALPHA, reduction="mean",
               tm_max=TM_MAX):
    """Focal loss over arbitrarily shaped logits/targets (mean or sum)."""
    assert pred.shape == true.shape
    n = int(pred.size)
    if reduction not in ("mean", "sum"):
        # TODO(synk): reduction='none' (elementwise map output) not implemented.
        raise NotImplementedError("reduction='none' not supported by this kernel")

    flat_p = pred.reshape(-1)       # dtype passes through (bf16 stays bf16)
    flat_t = true.reshape(-1)

    align = max(_row_align(pred.dtype), _row_align(true.dtype))
    tm_cap = max(align, (min(tm_max, TM_MAX) // align) * align)

    tail_sum = jnp.float32(0.0)
    rows = n // LANE

    if n % LANE == 0 and rows >= align:
        # Zero-copy path: reshaping the flat contiguous buffer is a bitcast and
        # the grid only visits full (tm,128) blocks, so no pad/copy of the bulk.
        tm = min(tm_cap, (rows // align) * align)
        n_blocks = rows // tm
        covered = n_blocks * tm
        p2 = flat_p.reshape(rows, LANE)
        t2 = flat_t.reshape(rows, LANE)
        if covered < rows:
            # < tm leftover rows: summed in plain JAX instead of padding and
            # re-copying the whole array (bounded, tiny vs. the bulk).
            tail_sum = _focal_elementwise_sum(p2[covered:], t2[covered:],
                                              gamma, alpha)
    else:
        # Lane-ragged (n % 128 != 0) or tiny input: pad once with sentinel
        # values whose focal loss is exactly 0, so no in-kernel mask is needed.
        rows_up = pl.cdiv(n, LANE)
        tm = min(tm_cap, pl.cdiv(rows_up, align) * align)
        n_blocks = pl.cdiv(rows_up, tm)
        padded = n_blocks * tm * LANE
        p2 = jnp.pad(flat_p, (0, padded - n),
                     constant_values=PAD_LOGIT).reshape(n_blocks * tm, LANE)
        t2 = jnp.pad(flat_t, (0, padded - n)).reshape(n_blocks * tm, LANE)

    kernel = functools.partial(_focal_loss_kernel, tm=tm,
                               gamma=float(gamma), alpha=float(alpha))

    partials = pl.pallas_call(
        kernel,
        out_shape=jax.ShapeDtypeStruct((n_blocks * 8, LANE), jnp.float32),
        grid_spec=pltpu.PrefetchScalarGridSpec(
            num_scalar_prefetch=0,
            grid=(n_blocks,),
            in_specs=[
                pl.BlockSpec((tm, LANE), lambda i: (i, 0)),
                pl.BlockSpec((tm, LANE), lambda i: (i, 0)),
            ],
            out_specs=pl.BlockSpec((8, LANE), lambda i: (i, 0)),
        ),
        compiler_params=pltpu.CompilerParams(
            # Blocks are fully independent (each writes its own (8,128) tile).
            # TODO(synk): on v7x, profile and switch to pltpu.CORE_PARALLEL (or
            # a leading core axis via core_map) if one TC can't saturate HBM.
            dimension_semantics=("parallel",),
            vmem_limit_bytes=_vmem_limit_bytes(),
        ),
    )(p2, t2)

    total = jnp.sum(partials, dtype=jnp.float32) + tail_sum
    if reduction == "mean":
        return total / jnp.float32(n)
    return total


def _focal_loss_ref(pred, true, gamma=GAMMA, alpha=ALPHA):
    x = pred.astype(jnp.float32)
    y = true.astype(jnp.float32)
    bce = jnp.maximum(x, 0.0) - x * y + jnp.log1p(jnp.exp(-jnp.abs(x)))
    p = jax.nn.sigmoid(x)
    p_t = y * p + (1 - y) * (1 - p)
    alpha_factor = y * alpha + (1 - y) * (1 - alpha)
    modulating = (1.0 - p_t) ** gamma
    return jnp.mean(bce * alpha_factor * modulating)


if __name__ == "__main__":
    key = jax.random.PRNGKey(0)
    ks = jax.random.split(key, 12)

    def check(name, pred, true, **kw):
        out = jax.block_until_ready(focal_loss(pred, true, **kw))
        ref = _focal_loss_ref(pred, true)
        # rtol loosened slightly to cover pl.reciprocal(approx=True).
        assert jnp.allclose(out, ref, rtol=2e-3, atol=1e-6), (name, out, ref)

    # 1) Small NCHW-like shape (lane-aligned, zero-copy, grid = 1).
    pred = jax.random.normal(ks[0], (2, 4, 16, 16), dtype=jnp.float32) * 2.0
    true = (jax.random.uniform(ks[1], (2, 4, 16, 16)) > 0.8).astype(jnp.float32)
    check("nchw", pred, true)

    # 1b) reduction='sum' on the same inputs.
    out_sum = jax.block_until_ready(focal_loss(pred, true, reduction="sum"))
    ref_sum = _focal_loss_ref(pred, true) * pred.size
    assert jnp.allclose(out_sum, ref_sum, rtol=2e-3, atol=1e-3), (out_sum, ref_sum)

    # 2) Lane-ragged size (sentinel-value pad path, no in-kernel mask).
    pred_r = jax.random.normal(ks[2], (3, 7, 11), dtype=jnp.float32) * 2.0
    true_r = (jax.random.uniform(ks[3], (3, 7, 11)) > 0.8).astype(jnp.float32)
    check("ragged", pred_r, true_r)

    # 3) Multi-block grid + leftover-rows tail (tm_max shrunk to force grid > 1).
    pred_m = jax.random.normal(ks[4], (2, 4, 80, 80), dtype=jnp.float32) * 2.0
    true_m = (jax.random.uniform(ks[5], (2, 4, 80, 80)) > 0.8).astype(jnp.float32)
    check("multiblock", pred_m, true_m, tm_max=128)

    # 4) Aligned rows not a multiple of the sublane tile (small plain-JAX tail).
    pred_s = jax.random.normal(ks[6], (4, 5, 128), dtype=jnp.float32) * 2.0
    true_s = (jax.random.uniform(ks[7], (4, 5, 128)) > 0.8).astype(jnp.float32)
    check("rowtail", pred_s, true_s)

    # 5) Large enough to exercise the in-kernel chunked fori_loop (tm=1024).
    pred_c = jax.random.normal(ks[8], (2, 4, 128, 128), dtype=jnp.float32) * 2.0
    true_c = (jax.random.uniform(ks[9], (2, 4, 128, 128)) > 0.8).astype(jnp.float32)
    check("chunked", pred_c, true_c)

    # 6) bf16 logits + bf16 hard labels (half the HBM bytes; upcast in-register).
    pred_b = (jax.random.normal(ks[10], (2, 4, 64, 64), dtype=jnp.float32) * 2.0
              ).astype(jnp.bfloat16)
    true_b = (jax.random.uniform(ks[11], (2, 4, 64, 64)) > 0.8).astype(jnp.bfloat16)
    check("bf16", pred_b, true_b)

    print("KERNEL_OK")
</pallas_src>

<mosaic_0001>
module attributes {stable_mosaic.version = 11 : i64} {
  func.func @_focal_loss_kernel(%arg0: i32, %arg1: memref<16x128xf32, #tpu.memory_space<vmem>>, %arg2: memref<16x128xf32, #tpu.memory_space<vmem>>, %arg3: memref<8x128xf32, #tpu.memory_space<vmem>>) attributes {dimension_semantics = [#tpu.dimension_semantics<parallel>], iteration_bounds = array<i64: 1>, scalar_prefetch = 0 : i64, scratch_operands = 0 : i64, tpu.core_type = #tpu.core_type<tc>, window_params = [{transform_indices = @transform_0, window_bounds = array<i64: 16, 128>}, {transform_indices = @transform_1, window_bounds = array<i64: 16, 128>}, {transform_indices = @transform_2, window_bounds = array<i64: 8, 128>}]} {
    %cst = arith.constant 0.000000e+00 : f32
    %0 = vector.broadcast %cst : f32 to vector<8x128xf32>
    %c0 = arith.constant 0 : index
    %c0_0 = arith.constant 0 : index
    %1 = vector.load %arg1[%c0, %c0_0] : memref<16x128xf32, #tpu.memory_space<vmem>>, vector<16x128xf32>
    %c0_1 = arith.constant 0 : index
    %c0_2 = arith.constant 0 : index
    %2 = vector.load %arg2[%c0_1, %c0_2] : memref<16x128xf32, #tpu.memory_space<vmem>>, vector<16x128xf32>
    %3 = math.absf %1 : vector<16x128xf32>
    %cst_3 = arith.constant 0.000000e+00 : f32
    %4 = vector.broadcast %cst_3 : f32 to vector<16x128xf32>
    %5 = arith.subf %4, %3 : vector<16x128xf32>
    %6 = math.exp %5 : vector<16x128xf32>
    %cst_4 = arith.constant 1.000000e+00 : f32
    %7 = vector.broadcast %cst_4 : f32 to vector<16x128xf32>
    %8 = arith.addf %7, %6 : vector<16x128xf32>
    %cst_5 = arith.constant 0.000000e+00 : f32
    %9 = vector.broadcast %cst_5 : f32 to vector<16x128xf32>
    %10 = arith.maximumf %1, %9 : vector<16x128xf32>
    %11 = arith.mulf %1, %2 : vector<16x128xf32>
    %12 = arith.subf %10, %11 : vector<16x128xf32>
    %13 = math.log %8 : vector<16x128xf32>
    %14 = arith.addf %12, %13 : vector<16x128xf32>
    %15 = tpu.reciprocal %8 {approx = true} : vector<16x128xf32> -> vector<16x128xf32>
    %cst_6 = arith.constant 0.000000e+00 : f32
    %16 = vector.broadcast %cst_6 : f32 to vector<16x128xf32>
    %17 = arith.cmpf oge, %1, %16 : vector<16x128xf32>
    %18 = arith.mulf %6, %15 : vector<16x128xf32>
    %19 = arith.select %17, %15, %18 : vector<16x128xi1>, vector<16x128xf32>
    %cst_7 = arith.constant 2.000000e+00 : f32
    %20 = vector.broadcast %cst_7 : f32 to vector<16x128xf32>
    %21 = arith.mulf %20, %19 : vector<16x128xf32>
    %cst_8 = arith.constant 1.000000e+00 : f32
    %22 = vector.broadcast %cst_8 : f32 to vector<16x128xf32>
    %23 = arith.subf %22, %21 : vector<16x128xf32>
    %24 = arith.mulf %2, %23 : vector<16x128xf32>
    %25 = arith.addf %19, %24 : vector<16x128xf32>
    %cst_9 = arith.constant 0.000000e+00 : f32
    %26 = vector.broadcast %cst_9 : f32 to vector<16x128xf32>
    %27 = arith.maximumf %25, %26 : vector<16x128xf32>
    %cst_10 = arith.constant -5.000000e-01 : f32
    %28 = vector.broadcast %cst_10 : f32 to vector<16x128xf32>
    %29 = arith.mulf %2, %28 : vector<16x128xf32>
    %cst_11 = arith.constant 7.500000e-01 : f32
    %30 = vector.broadcast %cst_11 : f32 to vector<16x128xf32>
    %31 = arith.addf %30, %29 : vector<16x128xf32>
    %32 = math.sqrt %27 : vector<16x128xf32>
    %33 = arith.mulf %27, %32 : vector<16x128xf32>
    %34 = arith.mulf %31, %33 : vector<16x128xf32>
    %35 = arith.mulf %14, %34 : vector<16x128xf32>
    %36 = vector.shape_cast %35 : vector<16x128xf32> to vector<2x8x128xf32>
    %cst_12 = arith.constant dense<0.000000e+00> : vector<8x128xf32>
    %37 = vector.multi_reduction <add>, %36, %cst_12 [0] : vector<2x8x128xf32> to vector<8x128xf32>
    %38 = arith.addf %0, %37 : vector<8x128xf32>
    %c0_13 = arith.constant 0 : index
    %c0_14 = arith.constant 0 : index
    %39 = vector.load %arg3[%c0_13, %c0_14] : memref<8x128xf32, #tpu.memory_space<vmem>>, vector<8x128xf32>
    tpu.vector_store %arg3[%c0_13, %c0_14], %38 {strides = array<i32>} : memref<8x128xf32, #tpu.memory_space<vmem>>, vector<8x128xf32>,
    return
  }
  func.func @transform_0(%arg0: i32) -> (i32, i32) {
    %c0_i32 = arith.constant 0 : i32
    %c0_i32_0 = arith.constant 0 : i32
    return %arg0, %c0_i32 : i32, i32
  }
  func.func @transform_1(%arg0: i32) -> (i32, i32) {
    %c0_i32 = arith.constant 0 : i32
    %c0_i32_0 = arith.constant 0 : i32
    return %arg0, %c0_i32 : i32, i32
  }
  func.func @transform_2(%arg0: i32) -> (i32, i32) {
    %c0_i32 = arith.constant 0 : i32
    %c0_i32_0 = arith.constant 0 : i32
    return %arg0, %c0_i32 : i32, i32
  }
}

</mosaic_0001>

<bundles_post_ra>
// kernel: tpu_custom_call.1
= control target key start
LH: loop header
LB: loop body
LE: loop exit
PB: predicated region body
PF: predicated region fallthrough
CT: control target
= control target key end

     0   :  { %7 = vsyncpa [#allocation3], 0  ;;  %s243_s0 = inlined_call_operand.hbm [shape: f32[16,128], index: 0, kind: input, shape index: {}]   ;;  %s244_s1 = inlined_call_operand.hbm [shape: f32[16,128], index: 1, kind: input, shape index: {}]   ;;  %s245_s2 = inlined_call_operand.hbm [shape: f32[8,128], index: 2, kind: output, shape index: {}]  }
   0x1   :  { %8 = vsyncpa [#allocation6], 0 }
   0x2   :  { %9 = vsyncpa [#allocation4], 0  ;;  %s214_s9 = smov [#allocation2]  }
   0x3   :  { %s15_s10 = sshll.u32 %s214_s9, 4  ;;  %s16_s10 = int_to_ptr.vmem [resolvable:$true] %s15_s10 }
   0x4   :  { %s156_s11 = scalar_lea.vmem %s16_s10, 256  ;;  %p161_p1 = scmp.lt.s32.totalorder %s16_s10, %s16_s10 }
   0x5   :  { %p157_p0 = scmp.ne.s32.totalorder %s16_s10, %s156_s11  ;;  %p162_p2 = scmp.lt.s32.totalorder %s156_s11, %s156_s11 }
   0x7   :  { %p163_p3 = por %p162_p2, %p161_p1 }
   0x9   :  { %p164_p4 = pnand %p163_p3, %p157_p0 }
   0xb   :  { %167 = shalt.err (!%p164_p4)
}
   0xc   :  { %s215_s12 = smov 128   ;;  %s216_s13 = smov 8  }
   0xd   :  { %21 = dma.hbm_to_vmem [thread:$0]  %s243_s0, 256, %s16_s10, [#allocation3], %s215_s12, %s215_s12, %s216_s13  }
   0xe   :  { %s217_s16 = smov [#allocation5]  }
   0xf   :  { %s27_s17 = sshll.u32 %s217_s16, 4  ;;  %s28_s17 = int_to_ptr.vmem [resolvable:$true] %s27_s17 }
  0x10   :  { %s176_s18 = scalar_lea.vmem %s28_s17, 256  ;;  %p181_p6 = scmp.lt.s32.totalorder %s28_s17, %s28_s17 }
  0x11   :  { %p177_p5 = scmp.ne.s32.totalorder %s28_s17, %s176_s18  ;;  %p182_p7 = scmp.lt.s32.totalorder %s176_s18, %s176_s18 }
  0x13   :  { %p183_p8 = por %p182_p7, %p181_p6 }
  0x15   :  { %p184_p9 = pnand %p183_p8, %p177_p5 }
  0x17   :  { %187 = shalt.err (!%p184_p9)
}
  0x18   :  { %33 = dma.hbm_to_vmem [thread:$0]  %s244_s1, 256, %s28_s17, [#allocation6], %s215_s12, %s215_s12, %s216_s13  }
  0x19   :  { %208 = dma.done.wait [#allocation3], 256  }
  0x1a   :  { %209 = vsyncadd [#allocation3], 4294967040 }
  0x1b   :  { %210 = dma.done.wait [#allocation6], 256  }
  0x1c   :  { %211 = vsyncadd [#allocation6], 4294967040  ;;  %v40_v0 = vld [vmem:[#allocation2] sm:$0xff]  ;;  %v41_v1 = vld [vmem:[#allocation2 + $0x8] sm:$0xff]  ;;  %s218_s0 = smov [#allocation7]  }
  0x1d   :  { %v44_v2 = vand.u32 2147483647, %v40_v0  ;;  %v45_v3 = vand.u32 2147483647, %v41_v1  ;;  %vm68_vm0 = vcmp.ge.f32.partialorder %v40_v0, 0.0  ;;  %vm69_vm1 = vcmp.ge.f32.partialorder %v41_v1, 0.0 }
  0x1e   :  { %v42_v19 = vld [vmem:[#allocation5] sm:$0xff]  ;;  %v43_v21 = vld [vmem:[#allocation5 + $0x8] sm:$0xff]  ;;  %v54_v30 = vmax.f32 %v40_v0, 0.0  ;;  %v55_v33 = vmax.f32 %v41_v1, 0.0  ;;  %s117_s1 = sshll.u32 %s218_s0, 4  ;;  %s118_s1 = int_to_ptr.vmem [resolvable:$true] %s117_s1 }
  0x1f   :  { %v46_v4 = vsub.f32 0.0, %v44_v2  ;;  %v47_v5 = vsub.f32 0.0, %v45_v3  ;;  %v56_v31 = vmul.f32 %v42_v19, %v40_v0  ;;  %v57_v34 = vmul.f32 %v43_v21, %v41_v1  ;;  %s188_s21 = scalar_lea.vmem %s118_s1, 128  ;;  %p193_p11 = scmp.lt.s32.totalorder %s118_s1, %s118_s1 }
  0x20   :  { %v84_v37 = vmul.f32 -0.5, %v42_v19  ;;  %v85_v40 = vmul.f32 -0.5, %v43_v21  ;;  %p189_p10 = scmp.ne.s32.totalorder %s118_s1, %s188_s21  ;;  %p194_p12 = scmp.lt.s32.totalorder %s188_s21, %s188_s21 }
  0x21   :  { %v48_v6 = vmul.f32 1.442695, %v46_v4  ;;  %v50_v7 = vmul.f32 1.442695, %v47_v5  ;;  %v58_v36 = vsub.f32 %v54_v30, %v56_v31  ;;  %v59_v45 = vsub.f32 %v55_v33, %v57_v34 }
  0x22   :  { %v86_v48 = vadd.f32 0.75, %v84_v37  ;;  %v87_v50 = vadd.f32 0.75, %v85_v40  ;;  %p195_p13 = por %p194_p12, %p193_p11 }
  0x23   :  { %132 = vpow2.f32 %v48_v6 }
  0x24   :  { %134 = vpow2.f32 %v50_v7  ;;  %p196_p0 = pnand %p195_p13, %p189_p10 }
  0x30   :  { %v133_v8 = vpop.eup %132 }
  0x31   :  { %v135_v9 = vpop.eup %134  ;;  %v52_v10 = vadd.f32 1.0, %v133_v8 }
  0x32   :  { %v53_v11 = vadd.f32 1.0, %v135_v9 }
  0x33   :  { %136 = vrcp.f32 %v52_v10 }
  0x34   :  { %138 = vrcp.f32 %v53_v11 }
  0x35   :  { %140 = vlog2.f32 %v52_v10 }
  0x36   :  { %142 = vlog2.f32 %v53_v11 }
  0x40   :  { %v137_v12 = vpop.eup %136 }
  0x41   :  { %v139_v13 = vpop.eup %138  ;;  %v70_v14 = vmul.f32 %v137_v12, %v133_v8 }
  0x42   :  { %v71_v15 = vmul.f32 %v139_v13, %v135_v9  ;;  %v141_v32 = vpop.eup %140 }
  0x43   :  { %v72_v16 = vsel %vm68_vm0, %v137_v12, %v70_v14  ;;  %v143_v35 = vpop.eup %142  ;;  %v61_v39 = vmul.f32 0.6931472, %v141_v32 }
  0x44   :  { %v73_v17 = vsel %vm69_vm1, %v139_v13, %v71_v15  ;;  %v74_v18 = vmul.f32 2.0, %v72_v16  ;;  %v63_v46 = vmul.f32 0.6931472, %v143_v35 }
  0x45   :  { %v75_v20 = vmul.f32 2.0, %v73_v17  ;;  %v64_v53 = vadd.f32 %v61_v39, %v58_v36 }
  0x46   :  { %v76_v22 = vsub.f32 1.0, %v74_v18  ;;  %v65_v56 = vadd.f32 %v63_v46, %v59_v45 }
  0x47   :  { %v77_v23 = vsub.f32 1.0, %v75_v20 }
  0x48   :  { %v78_v24 = vmul.f32 %v76_v22, %v42_v19 }
  0x49   :  { %v79_v25 = vmul.f32 %v77_v23, %v43_v21 }
  0x4a   :  { %v80_v26 = vadd.f32 %v78_v24, %v72_v16 }
  0x4b   :  { %v81_v27 = vadd.f32 %v79_v25, %v73_v17 }
  0x4c   :  { %v82_v28 = vmax.f32 %v80_v26, 0.0 }
  0x4d   :  { %v83_v29 = vmax.f32 %v81_v27, 0.0 }
  0x4e   :  { %144 = vrsqrt.f32 %v82_v28  ;;  %vm90_vm2 = vcmp.eq.f32.partialorder %v82_v28, inf  ;;  %v93_v41 = vand.u32 2147483648, %v82_v28  ;;  %vm92_vm3 = vcmp.eq.f32.partialorder %v82_v28, 0.0 }
  0x4f   :  { %146 = vrsqrt.f32 %v83_v29  ;;  %vm97_vm4 = vcmp.eq.f32.partialorder %v83_v29, inf  ;;  %v100_v44 = vand.u32 2147483648, %v83_v29  ;;  %vm99_vm5 = vcmp.eq.f32.partialorder %v83_v29, 0.0 }
  0x5b   :  { %v145_v38 = vpop.eup %144 }
  0x5c   :  { %v147_v42 = vpop.eup %146  ;;  %v89_v43 = vmul.f32 %v145_v38, %v82_v28 }
  0x5d   :  { %v96_v47 = vmul.f32 %v147_v42, %v83_v29 }
  0x5e   :  { %v91_v49 = vsel %vm90_vm2, %v82_v28, %v89_v43 }
  0x5f   :  { %v94_v51 = vsel %vm92_vm3, %v93_v41, %v91_v49  ;;  %v98_v52 = vsel %vm97_vm4, %v83_v29, %v96_v47 }
  0x60   :  { %v101_v54 = vsel %vm99_vm5, %v100_v44, %v98_v52  ;;  %v102_v55 = vmul.f32 %v94_v51, %v82_v28 }
  0x61   :  { %v103_v57 = vmul.f32 %v101_v54, %v83_v29 }
  0x62   :  { %v104_v58 = vmul.f32 %v102_v55, %v86_v48 }
  0x63   :  { %v105_v59 = vmul.f32 %v103_v57, %v87_v50 }
  0x64   :  { %v106_v60 = vmul.f32 %v104_v58, %v64_v53 }
  0x65   :  { %v107_v61 = vmul.f32 %v105_v59, %v65_v56 }
  0x67   :  { %v108_v62 = vadd.f32 %v107_v61, %v106_v60 }
  0x69   :  { %110 = vst [vmem:[#allocation7] sm:$0xff] %v108_v62 }
  0x6a   :  { %199 = shalt.err (!%p196_p0)
}
  0x6b   :  { %120 = dma.vmem_to_hbm [thread:$0]  %s118_s1, 128, %s245_s2, [#allocation4]  }
  0x6c   :  { %212 = dma.done.wait [#allocation4], 128  }
  0x6d   :  { %213 = vsyncadd [#allocation4], 4294967168 }
  0x6e   :  { %124 = vsyncpa [#allocation3], 1 }
  0x6f   :  { %125 = vsyncpa [#allocation6], 1 }
  0x70   :  { %126 = vsyncpa [#allocation4], 1 }

</bundles_post_ra>
